<compile_context>
chip_gen: v5e
topology: v5e:2x2
jax: 0.10.0
libtpu: 0.0.40
codegen_flags: <defaults>
</compile_context>

<pallas_src>
import jax
import jax.numpy as jnp
from jax.experimental import pallas as pl
from jax.experimental.pallas import tpu as pltpu


def _mlp_kernel(x_ref, w1_ref, b1_ref, w2_ref, b2_ref, out_ref):
    """One batch tile of the forward pass.

    x_ref  : (2, TB)  VMEM  -- input features on sublanes, batch on lanes
    w1_ref : (8,)     SMEM  -- W1 (in=2, out=4), row-major flattened
    b1_ref : (4,)     SMEM
    w2_ref : (4,)     SMEM  -- W2 (in=4, out=1), flattened
    b2_ref : (1,)     SMEM
    out_ref: (1, TB)  VMEM  -- lane-dense output row
    """
    x0 = x_ref[0:1, :]          # (1, TB)  feature 0 across the batch
    x1 = x_ref[1:2, :]          # (1, TB)  feature 1 across the batch

    # Output pre-activation accumulator, initialized with the output bias.
    zo = jnp.zeros_like(x0) + b2_ref[0]

    # Unrolled over the 4 hidden units: pure VPU mul/add + one EUP tanh each.
    for j in range(4):
        zh_j = w1_ref[j] * x0 + w1_ref[4 + j] * x1 + b1_ref[j]   # (1, TB)
        ah_j = 0.5 * jnp.tanh(0.5 * zh_j) + 0.5                  # sigmoid
        zo = zo + w2_ref[j] * ah_j

    out_ref[...] = 0.5 * jnp.tanh(0.5 * zo) + 0.5                # sigmoid


def neural_net_forward(x, w1, b1, w2, b2, *, tb=512):
    """Forward pass of NeuralNet.

    x : (B, 2) float32
    w1: (2, 4), b1: (4,), w2: (4, 1), b2: (1,)   (W stored as (in, out), so
        the math is x @ W + b == PyTorch's x @ W.T + b)
    Returns (B, 1) float32.
    """
    B = x.shape[0]
    tb = int(tb)
    n_tiles = pl.cdiv(B, tb)
    Bp = n_tiles * tb

    # Batch onto the lane axis; zero-pad batch up to a tile multiple.
    x_t = jnp.pad(x.astype(jnp.float32).T, ((0, 0), (0, Bp - B)))   # (2, Bp)

    # Flatten the 17 parameters for SMEM residency.
    w1f = w1.astype(jnp.float32).reshape(-1)   # (8,)
    b1f = b1.astype(jnp.float32).reshape(-1)   # (4,)
    w2f = w2.astype(jnp.float32).reshape(-1)   # (4,)
    b2f = b2.astype(jnp.float32).reshape(-1)   # (1,)

    smem_spec = pl.BlockSpec(memory_space=pltpu.MemorySpace.SMEM)

    out_t = pl.pallas_call(
        _mlp_kernel,
        out_shape=jax.ShapeDtypeStruct((1, Bp), jnp.float32),
        grid_spec=pl.GridSpec(
            grid=(n_tiles,),
            in_specs=[
                pl.BlockSpec((2, tb), lambda i: (0, i)),   # x tile (batch on lanes)
                smem_spec,                                  # w1
                smem_spec,                                  # b1
                smem_spec,                                  # w2
                smem_spec,                                  # b2
            ],
            out_specs=pl.BlockSpec((1, tb), lambda i: (0, i)),
        ),
        compiler_params=pltpu.CompilerParams(
            dimension_semantics=("parallel",)),            # dual-TC on v7x
    )(x_t, w1f, b1f, w2f, b2f)

    return out_t[0, :B].reshape(B, 1)


def init_params(key):
    """Deterministic init mimicking nn.Linear's U(-1/sqrt(fan_in), 1/sqrt(fan_in))."""
    k1, k2, k3, k4 = jax.random.split(key, 4)
    bound1 = 1.0 / jnp.sqrt(2.0)   # fan_in = 2
    bound2 = 1.0 / jnp.sqrt(4.0)   # fan_in = 4
    # stored as (in_features, out_features) so forward computes x @ W + b
    w1 = jax.random.uniform(k1, (2, 4), jnp.float32, -bound1, bound1)
    b1 = jax.random.uniform(k2, (4,), jnp.float32, -bound1, bound1)
    w2 = jax.random.uniform(k3, (4, 1), jnp.float32, -bound2, bound2)
    b2 = jax.random.uniform(k4, (1,), jnp.float32, -bound2, bound2)
    return w1, b1, w2, b2


if __name__ == "__main__":
    key = jax.random.PRNGKey(0)
    kx, kp = jax.random.split(key)

    B = 1024                      # batch on lanes -> use a 128-multiple batch
    x = jax.random.normal(kx, (B, 2), jnp.float32)
    w1, b1, w2, b2 = init_params(kp)

    out = neural_net_forward(x, w1, b1, w2, b2, tb=512)
    jax.block_until_ready(out)

    # pure-JAX reference check (tanh-based sigmoid may differ at ~1e-6 level)
    ref = jax.nn.sigmoid(jax.nn.sigmoid(x @ w1 + b1) @ w2 + b2)
    assert out.shape == (B, 1)
    assert jnp.allclose(out, ref, atol=1e-4), "mismatch vs reference"

    print("KERNEL_OK")
</pallas_src>

<mosaic_0001>
module attributes {stable_mosaic.version = 11 : i64} {
  func.func @_mlp_kernel(%arg0: i32, %arg1: memref<2x512xf32, #tpu.memory_space<vmem>>, %arg2: memref<8xf32, #tpu.memory_space<smem>>, %arg3: memref<4xf32, #tpu.memory_space<smem>>, %arg4: memref<4xf32, #tpu.memory_space<smem>>, %arg5: memref<1xf32, #tpu.memory_space<smem>>, %arg6: memref<1x512xf32, #tpu.memory_space<vmem>>) attributes {dimension_semantics = [#tpu.dimension_semantics<parallel>], iteration_bounds = array<i64: 2>, scalar_prefetch = 0 : i64, scratch_operands = 0 : i64, tpu.core_type = #tpu.core_type<tc>, window_params = [{transform_indices = @transform_0, window_bounds = array<i64: 2, 512>}, {transform_indices = @transform_1, window_bounds = array<i64: 8>}, {transform_indices = @transform_2, window_bounds = array<i64: 4>}, {transform_indices = @transform_3, window_bounds = array<i64: 4>}, {transform_indices = @transform_4, window_bounds = array<i64: 1>}, {transform_indices = @transform_5, window_bounds = array<i64: 1, 512>}]} {
    %c0 = arith.constant 0 : index
    %c0_0 = arith.constant 0 : index
    %0 = vector.load %arg1[%c0, %c0_0] : memref<2x512xf32, #tpu.memory_space<vmem>>, vector<1x512xf32>
    %c1 = arith.constant 1 : index
    %c0_1 = arith.constant 0 : index
    %1 = vector.load %arg1[%c1, %c0_1] : memref<2x512xf32, #tpu.memory_space<vmem>>, vector<1x512xf32>
    %cst = arith.constant 0.000000e+00 : f32
    %2 = vector.broadcast %cst : f32 to vector<1x512xf32>
    %c0_2 = arith.constant 0 : index
    %3 = memref.load %arg5[%c0_2] : memref<1xf32, #tpu.memory_space<smem>>
    %4 = vector.broadcast %3 : f32 to vector<1x512xf32>
    %5 = arith.addf %2, %4 : vector<1x512xf32>
    %c0_3 = arith.constant 0 : index
    %6 = memref.load %arg2[%c0_3] : memref<8xf32, #tpu.memory_space<smem>>
    %7 = vector.broadcast %6 : f32 to vector<1x512xf32>
    %8 = arith.mulf %7, %0 : vector<1x512xf32>
    %c4 = arith.constant 4 : index
    %9 = memref.load %arg2[%c4] : memref<8xf32, #tpu.memory_space<smem>>
    %10 = vector.broadcast %9 : f32 to vector<1x512xf32>
    %11 = arith.mulf %10, %1 : vector<1x512xf32>
    %12 = arith.addf %8, %11 : vector<1x512xf32>
    %c0_4 = arith.constant 0 : index
    %13 = memref.load %arg3[%c0_4] : memref<4xf32, #tpu.memory_space<smem>>
    %14 = vector.broadcast %13 : f32 to vector<1x512xf32>
    %15 = arith.addf %12, %14 : vector<1x512xf32>
    %cst_5 = arith.constant 5.000000e-01 : f32
    %16 = vector.broadcast %cst_5 : f32 to vector<1x512xf32>
    %17 = arith.mulf %16, %15 : vector<1x512xf32>
    %18 = math.tanh %17 : vector<1x512xf32>
    %cst_6 = arith.constant 5.000000e-01 : f32
    %19 = vector.broadcast %cst_6 : f32 to vector<1x512xf32>
    %20 = arith.mulf %19, %18 : vector<1x512xf32>
    %cst_7 = arith.constant 5.000000e-01 : f32
    %21 = vector.broadcast %cst_7 : f32 to vector<1x512xf32>
    %22 = arith.addf %20, %21 : vector<1x512xf32>
    %c0_8 = arith.constant 0 : index
    %23 = memref.load %arg4[%c0_8] : memref<4xf32, #tpu.memory_space<smem>>
    %24 = vector.broadcast %23 : f32 to vector<1x512xf32>
    %25 = arith.mulf %24, %22 : vector<1x512xf32>
    %26 = arith.addf %5, %25 : vector<1x512xf32>
    %c1_9 = arith.constant 1 : index
    %27 = memref.load %arg2[%c1_9] : memref<8xf32, #tpu.memory_space<smem>>
    %28 = vector.broadcast %27 : f32 to vector<1x512xf32>
    %29 = arith.mulf %28, %0 : vector<1x512xf32>
    %c5 = arith.constant 5 : index
    %30 = memref.load %arg2[%c5] : memref<8xf32, #tpu.memory_space<smem>>
    %31 = vector.broadcast %30 : f32 to vector<1x512xf32>
    %32 = arith.mulf %31, %1 : vector<1x512xf32>
    %33 = arith.addf %29, %32 : vector<1x512xf32>
    %c1_10 = arith.constant 1 : index
    %34 = memref.load %arg3[%c1_10] : memref<4xf32, #tpu.memory_space<smem>>
    %35 = vector.broadcast %34 : f32 to vector<1x512xf32>
    %36 = arith.addf %33, %35 : vector<1x512xf32>
    %cst_11 = arith.constant 5.000000e-01 : f32
    %37 = vector.broadcast %cst_11 : f32 to vector<1x512xf32>
    %38 = arith.mulf %37, %36 : vector<1x512xf32>
    %39 = math.tanh %38 : vector<1x512xf32>
    %cst_12 = arith.constant 5.000000e-01 : f32
    %40 = vector.broadcast %cst_12 : f32 to vector<1x512xf32>
    %41 = arith.mulf %40, %39 : vector<1x512xf32>
    %cst_13 = arith.constant 5.000000e-01 : f32
    %42 = vector.broadcast %cst_13 : f32 to vector<1x512xf32>
    %43 = arith.addf %41, %42 : vector<1x512xf32>
    %c1_14 = arith.constant 1 : index
    %44 = memref.load %arg4[%c1_14] : memref<4xf32, #tpu.memory_space<smem>>
    %45 = vector.broadcast %44 : f32 to vector<1x512xf32>
    %46 = arith.mulf %45, %43 : vector<1x512xf32>
    %47 = arith.addf %26, %46 : vector<1x512xf32>
    %c2 = arith.constant 2 : index
    %48 = memref.load %arg2[%c2] : memref<8xf32, #tpu.memory_space<smem>>
    %49 = vector.broadcast %48 : f32 to vector<1x512xf32>
    %50 = arith.mulf %49, %0 : vector<1x512xf32>
    %c6 = arith.constant 6 : index
    %51 = memref.load %arg2[%c6] : memref<8xf32, #tpu.memory_space<smem>>
    %52 = vector.broadcast %51 : f32 to vector<1x512xf32>
    %53 = arith.mulf %52, %1 : vector<1x512xf32>
    %54 = arith.addf %50, %53 : vector<1x512xf32>
    %c2_15 = arith.constant 2 : index
    %55 = memref.load %arg3[%c2_15] : memref<4xf32, #tpu.memory_space<smem>>
    %56 = vector.broadcast %55 : f32 to vector<1x512xf32>
    %57 = arith.addf %54, %56 : vector<1x512xf32>
    %cst_16 = arith.constant 5.000000e-01 : f32
    %58 = vector.broadcast %cst_16 : f32 to vector<1x512xf32>
    %59 = arith.mulf %58, %57 : vector<1x512xf32>
    %60 = math.tanh %59 : vector<1x512xf32>
    %cst_17 = arith.constant 5.000000e-01 : f32
    %61 = vector.broadcast %cst_17 : f32 to vector<1x512xf32>
    %62 = arith.mulf %61, %60 : vector<1x512xf32>
    %cst_18 = arith.constant 5.000000e-01 : f32
    %63 = vector.broadcast %cst_18 : f32 to vector<1x512xf32>
    %64 = arith.addf %62, %63 : vector<1x512xf32>
    %c2_19 = arith.constant 2 : index
    %65 = memref.load %arg4[%c2_19] : memref<4xf32, #tpu.memory_space<smem>>
    %66 = vector.broadcast %65 : f32 to vector<1x512xf32>
    %67 = arith.mulf %66, %64 : vector<1x512xf32>
    %68 = arith.addf %47, %67 : vector<1x512xf32>
    %c3 = arith.constant 3 : index
    %69 = memref.load %arg2[%c3] : memref<8xf32, #tpu.memory_space<smem>>
    %70 = vector.broadcast %69 : f32 to vector<1x512xf32>
    %71 = arith.mulf %70, %0 : vector<1x512xf32>
    %c7 = arith.constant 7 : index
    %72 = memref.load %arg2[%c7] : memref<8xf32, #tpu.memory_space<smem>>
    %73 = vector.broadcast %72 : f32 to vector<1x512xf32>
    %74 = arith.mulf %73, %1 : vector<1x512xf32>
    %75 = arith.addf %71, %74 : vector<1x512xf32>
    %c3_20 = arith.constant 3 : index
    %76 = memref.load %arg3[%c3_20] : memref<4xf32, #tpu.memory_space<smem>>
    %77 = vector.broadcast %76 : f32 to vector<1x512xf32>
    %78 = arith.addf %75, %77 : vector<1x512xf32>
    %cst_21 = arith.constant 5.000000e-01 : f32
    %79 = vector.broadcast %cst_21 : f32 to vector<1x512xf32>
    %80 = arith.mulf %79, %78 : vector<1x512xf32>
    %81 = math.tanh %80 : vector<1x512xf32>
    %cst_22 = arith.constant 5.000000e-01 : f32
    %82 = vector.broadcast %cst_22 : f32 to vector<1x512xf32>
    %83 = arith.mulf %82, %81 : vector<1x512xf32>
    %cst_23 = arith.constant 5.000000e-01 : f32
    %84 = vector.broadcast %cst_23 : f32 to vector<1x512xf32>
    %85 = arith.addf %83, %84 : vector<1x512xf32>
    %c3_24 = arith.constant 3 : index
    %86 = memref.load %arg4[%c3_24] : memref<4xf32, #tpu.memory_space<smem>>
    %87 = vector.broadcast %86 : f32 to vector<1x512xf32>
    %88 = arith.mulf %87, %85 : vector<1x512xf32>
    %89 = arith.addf %68, %88 : vector<1x512xf32>
    %cst_25 = arith.constant 5.000000e-01 : f32
    %90 = vector.broadcast %cst_25 : f32 to vector<1x512xf32>
    %91 = arith.mulf %90, %89 : vector<1x512xf32>
    %92 = math.tanh %91 : vector<1x512xf32>
    %cst_26 = arith.constant 5.000000e-01 : f32
    %93 = vector.broadcast %cst_26 : f32 to vector<1x512xf32>
    %94 = arith.mulf %93, %92 : vector<1x512xf32>
    %cst_27 = arith.constant 5.000000e-01 : f32
    %95 = vector.broadcast %cst_27 : f32 to vector<1x512xf32>
    %96 = arith.addf %94, %95 : vector<1x512xf32>
    %c0_28 = arith.constant 0 : index
    %c0_29 = arith.constant 0 : index
    %97 = vector.load %arg6[%c0_28, %c0_29] : memref<1x512xf32, #tpu.memory_space<vmem>>, vector<1x512xf32>
    tpu.vector_store %arg6[%c0_28, %c0_29], %96 {strides = array<i32>} : memref<1x512xf32, #tpu.memory_space<vmem>>, vector<1x512xf32>,
    return
  }
  func.func @transform_0(%arg0: i32) -> (i32, i32) {
    %c0_i32 = arith.constant 0 : i32
    %c0_i32_0 = arith.constant 0 : i32
    return %c0_i32, %arg0 : i32, i32
  }
  func.func @transform_1(%arg0: i32) -> i32 {
    %c0_i32 = arith.constant 0 : i32
    %c0_i32_0 = arith.constant 0 : i32
    return %c0_i32 : i32
  }
  func.func @transform_2(%arg0: i32) -> i32 {
    %c0_i32 = arith.constant 0 : i32
    %c0_i32_0 = arith.constant 0 : i32
    return %c0_i32 : i32
  }
  func.func @transform_3(%arg0: i32) -> i32 {
    %c0_i32 = arith.constant 0 : i32
    %c0_i32_0 = arith.constant 0 : i32
    return %c0_i32 : i32
  }
  func.func @transform_4(%arg0: i32) -> i32 {
    %c0_i32 = arith.constant 0 : i32
    %c0_i32_0 = arith.constant 0 : i32
    return %c0_i32 : i32
  }
  func.func @transform_5(%arg0: i32) -> (i32, i32) {
    %c0_i32 = arith.constant 0 : i32
    %c0_i32_0 = arith.constant 0 : i32
    return %c0_i32, %arg0 : i32, i32
  }
}

</mosaic_0001>

<bundles_post_ra>
// kernel: tpu_custom_call.1
= control target key start
LH: loop header
LB: loop body
LE: loop exit
PB: predicated region body
PF: predicated region fallthrough
CT: control target
= control target key end

     0   :  { %s946_s0 = inlined_call_operand.hbm [shape: f32[2,1024], index: 0, kind: input, shape index: {}]   ;;  %s947_s1 = inlined_call_operand.vmem [shape: f32[8], index: 1, kind: input, shape index: {}]   ;;  %s948_s2 = inlined_call_operand.vmem [shape: f32[4], index: 2, kind: input, shape index: {}]   ;;  %s949_s3 = inlined_call_operand.vmem [shape: f32[4], index: 3, kind: input, shape index: {}]   ;;  %s950_s4 = inlined_call_operand.<no memory space> [shape: f32[1], index: 4, kind: input, shape index: {}]   ;;  %s951_s5 = inlined_call_operand.hbm [shape: f32[1,1024], index: 5, kind: output, shape index: {}]  }
   0x1   :  { %10 = sst [smem:[#allocation2]] %s950_s4 }
   0x2   :  { %11 = vsyncpa [#allocation4], 0 }
   0x3   :  { %13 = vsyncpa [#allocation4 + $0x1], 0 }
   0x4   :  { %14 = vsyncpa [#allocation6], 0 }
   0x5   :  { %15 = vsyncpa [#allocation9], 0 }
   0x6   :  { %16 = vsyncpa [#allocation5], 0 }
   0x7   :  { %18 = vsyncpa [#allocation5 + $0x1], 0  ;;  %s797_s20 = smov 0   ;;  %s799_s21 = smov 0  }
   0x8   :  { %s801_s22 = smov 0   ;;  %s803_s23 = smov 0  }
   0x9 LB: > { %s818_s4 = sadd.s32 4294967295, %s759_s23   ;;  %s489_s24 = sadd.s32 4294967294, %s759_s23   ;;  %s759_s23 = sphi %s803_s23, %s961_s23   ;;  %s755_s22 = sphi %s801_s22, %s960_s22   ;;  %s751_s21 = sphi %s799_s21, %s959_s21   ;;  %s747_s20 = sphi %s797_s20, %s958_s20  }
   0xa   : > { %p44_p0 = scmp.ne.s32.totalorder %s751_s21, %s747_s20  ;;  %p45_p1 = scmp.eq.s32.totalorder %s818_s4, 0 }
   0xb   : > { %p152_p2 = scmp.eq.s32.totalorder %s818_s4, 1  ;;  %p158_p3 = scmp.eq.s32.totalorder %s489_s24, 1 }
   0xc   : > { %p827_p4 = por %p45_p1, %p44_p0  ;;  %p490_p5 = scmp.ge.s32.totalorder %s759_s23, 1 }
   0xd   : > { %p832_p6 = por %p158_p3, %p44_p0  ;;  %p165_p7 = scmp.lt.s32.totalorder %s759_s23, 3 }
   0xe   : > { %s187_s29 = sshll.u32 %s948_s2, 4  ;;  %s177_s8 = sshll.u32 %s947_s1, 4  ;;  %s188_s29 = int_to_ptr.vmem [resolvable:$true] %s187_s29  ;;  %s178_s8 = int_to_ptr.vmem [resolvable:$true] %s177_s8 }
   0xf   : > { %p840_p8 = pnand %p490_p5, %p165_p7  ;;  %s197_s11 = sshll.u32 %s949_s3, 4  ;;  %s198_s11 = int_to_ptr.vmem [resolvable:$true] %s197_s11 }
  0x10   : > { %s761_s12 = smov [#allocation8]   ;;  %s762_s13 = smov [#allocation7]  }
  0x11   : > { %p539_p10 = pneg %p840_p8  ;;  %s763_s14 = smov [#allocation10]  }
  0x12   : > { %s856_s15 = sadd.s32 1, %s759_s23   ;;  %s31_s17 = sadd.s32 1, %s755_s22 }
  0x13   : > { %p540_p11 = pnand %p539_p10, %p45_p1  ;;  %s28_s16 = ssub.s32 %s759_s23, %s856_s15 }
  0x14   : > { %p29_p12 = scmp.eq.s32.totalorder %s28_s16, 0  ;;  %p38_p13 = scmp.ne.s32.totalorder %s755_s22, %s751_s21 }
  0x15   : > { %545 = dma.vmem_to_smem (!%p540_p11), %s188_s29, 16, %s761_s12, [#allocation9]  }
  0x16   : > { %542 = dma.vmem_to_smem (!%p540_p11), %s178_s8, 16, %s762_s13, [#allocation6]  }
  0x17   : > { %548 = dma.vmem_to_smem (!%p540_p11), %s198_s11, 16, %s763_s14, [#allocation9]  }
  0x18   : > { %p39_p0 = scmp.eq.s32.totalorder %s759_s23, 0  ;;  %p869_p3 = por %p152_p2, %p38_p13 }
  0x19   : > { %s865_s18 = scalar_select %p29_p12, %s755_s22, %s31_s17  }
  0x1a   : > { %p560_p5 = scmp.lt.s32.totalorder %s759_s23, 2  ;;  %s211_s24 = sand.u32 1, %s755_s22  }
  0x1b   : > { %s522_s27 = sshll.u32 %s759_s23, 3  ;;  %p40_p7 = por %p39_p0, %p38_p13 }
  0x1c   : > { %s495_s28 = sshll.u32 %s211_s24, 3  ;;  %s220_s7 = scalar_lea.hbm %s946_s0, %s522_s27 }
  0x1d   : > { %s222_s8 = sshll.u32 %s220_s7, 4  ;;  %s215_s9 = scalar_lea.vmem [#allocation3], %s495_s28  ;;  %s223_s8 = int_to_ptr.hbm [resolvable:$true] %s222_s8 }
  0x1e   : > { %s224_s10 = sshll.u32 %s215_s9, 4  ;;  %p879_p10 = pnand %p560_p5, %p40_p7  ;;  %s225_s10 = int_to_ptr.vmem [resolvable:$true] %s224_s10 }
  0x1f   : > { %s212_s12 = scalar_lea.sflag [#allocation4], %s211_s24  ;;  %s655_s13 = sshra.s32 %s223_s8, 4  ;;  %s656_s13 = int_to_ptr.hbm [resolvable:$true] %s655_s13 }
  0x20   : > { %s657_s14 = scalar_lea.hbm %s656_s13, 8  ;;  %p659_p11 = pneg %p879_p10 }
  0x21   : > { %p658_p2 = scmp.ne.s32.totalorder %s656_s13, %s657_s14  ;;  %s662_s27 = scalar_lea.hbm %s946_s0, 16 }
  0x22   : > { %p663_p0 = scmp.lt.s32.totalorder %s656_s13, %s946_s0  ;;  %p664_p5 = scmp.lt.s32.totalorder %s662_s27, %s657_s14 }
  0x23   : > { %p660_p12 = pnand %p659_p11, %p658_p2 }
  0x24   : > { %p665_p7 = por %p664_p5, %p663_p0 }
  0x25   : > { %p661_p13 = pneg %p660_p12 }
  0x27   : > { %p666_p9 = pnand %p665_p7, %p661_p13 }
  0x29   : > { %669 = shalt.err (!%p666_p9)
}
  0x2a   : > { %552 = dma.hbm_to_vmem [thread:$0]  (!%p879_p10), %s223_s8, 128, %s225_s10, %s212_s12  }
  0x2b   : > { %233 = sbr.rel (%p840_p8) target bundleno = 111 (0x6f), region = 40  ;;  %s896_s24 = sand.u32 (!%p840_p8), 1, %s751_s21  }
  0x2c   : > { %s499_s6 = sshll.u32 (!%p840_p8), %s896_s24, 3  ;;  %s236_s7 = scalar_lea.sflag (!%p840_p8), [#allocation4], %s896_s24 }
  0x2d   : > { %s239_s9 = scalar_lea.vmem (!%p840_p8), [#allocation3], %s499_s6 }
  0x30   : > { %730 = dma.done.wait (%p827_p4), %s236_s7, 128  }
  0x31   : > { %732 = vsyncadd (%p827_p4), %s236_s7, 4294967168 }
  0x32   : > { %734 = dma.done.wait (%p45_p1), [#allocation6], 16  }
  0x33   : > { %736 = vsyncadd (%p45_p1), [#allocation6], 4294967280 }
  0x34   : > { %738 = dma.done.wait (%p45_p1), [#allocation9], 32  }
  0x35   : > { %740 = vsyncadd (%p45_p1), [#allocation9], 4294967264 }
  0x36   : > { %260 = sfence }
  0x37   : > { %s291_s30 = sld [smem:[#allocation7]]  ;;  %v285_v0 = vld [vmem:[%s239_s9] ss:$2 sm:$0xf]  ;;  %v367_v60 = vlaneseq }
  0x38   : > { %s505_s8 = sld [smem:[#allocation7 + $0x4]]  ;;  %v504_v1 = vld [vmem:[%s239_s9 + $0x1] ss:$2 sm:$0xf] }
  0x39   : > { %s298_s10 = sld [smem:[#allocation8]]  ;;  %vm369_vm0 = vcmp.lt.s32.totalorder %v367_v60, 512 }
  0x3a   : > { %s506_s11 = sld [smem:[#allocation7 + $0x1]] }
  0x3b   : > { %s507_s25 = sld [smem:[#allocation7 + $0x5]] }
  0x3c   : > { %s508_s12 = sld [smem:[#allocation8 + $0x1]] }
  0x3d   : > { %v292_v2 = vstv %s291_s30  ;;  %s510_s13 = sld [smem:[#allocation7 + $0x2]] }
  0x3e   : > { %v293_v3 = vmul.f32 %v292_v2, %v285_v0  ;;  %v295_v4 = vstv %s505_s8  ;;  %s511_s14 = sld [smem:[#allocation7 + $0x6]]  ;;  %s503_s8 = sshll.u32 %s896_s24, 2 }
  0x3f   : > { %v296_v5 = vmul.f32 %v504_v1, %v295_v4  ;;  %v299_v6 = vstv %s298_s10  ;;  %s512_s16 = sld [smem:[#allocation8 + $0x2]]  ;;  %s519_s10 = sshll.u32 %s818_s4, 2 }
  0x40   : > { %v310_v8 = vstv %s506_s11  ;;  %s514_s17 = sld [smem:[#allocation7 + $0x3]] }
  0x41   : > { %v297_v7 = vadd.f32 %v296_v5, %v293_v3  ;;  %v311_v9 = vmul.f32 %v310_v8, %v285_v0  ;;  %v313_v10 = vstv %s507_s25  ;;  %s515_s27 = sld [smem:[#allocation7 + $0x7]] }
  0x42   : > { %v314_v12 = vmul.f32 %v504_v1, %v313_v10  ;;  %v317_v13 = vstv %s508_s12  ;;  %s516_s28 = sld [smem:[#allocation8 + $0x3]]  ;;  %s383_s12 = scalar_lea.hbm %s951_s5, %s519_s10 }
  0x43   : > { %v300_v11 = vadd.f32 %v299_v6, %v297_v7  ;;  %v328_v16 = vstv %s510_s13  ;;  %s305_s29 = sld [smem:[#allocation10]]  ;;  %s282_s13 = scalar_lea.vmem [#allocation11], %s503_s8 }
  0x44   : > { %v315_v15 = vadd.f32 %v314_v12, %v311_v9  ;;  %v329_v17 = vmul.f32 %v328_v16, %v285_v0  ;;  %v331_v18 = vstv %s511_s14  ;;  %s288_s6 = sld [smem:[#allocation2]]  ;;  %s385_s14 = sshll.u32 %s282_s13, 4  ;;  %s386_s14 = int_to_ptr.vmem [resolvable:$true] %s385_s14 }
  0x45   : > { %v301_v14 = vmul.f32 0.5, %v300_v11  ;;  %v332_v20 = vmul.f32 %v504_v1, %v331_v18  ;;  %v335_v21 = vstv %s512_s16  ;;  %s509_s7 = sld [smem:[#allocation10 + $0x1]]  ;;  %s387_s16 = sshll.u32 %s383_s12, 4  ;;  %s388_s16 = int_to_ptr.hbm [resolvable:$true] %s387_s16 }
  0x46   : > { %v318_v19 = vadd.f32 %v317_v13, %v315_v15  ;;  %v346_v24 = vstv %s514_s17  ;;  %s513_s9 = sld [smem:[#allocation10 + $0x2]]  ;;  %s373_s17 = scalar_lea.sflag [#allocation5], %s896_s24 }
  0x47   : > { %600 = vtanh.f32 %v301_v14  ;;  %v333_v23 = vadd.f32 %v332_v20, %v329_v17  ;;  %v347_v25 = vmul.f32 %v346_v24, %v285_v0  ;;  %v349_v26 = vstv %s515_s27  ;;  %s517_s30 = sld [smem:[#allocation10 + $0x3]]  ;;  %s699_s27 = sshra.s32 %s388_s16, 4  ;;  %s700_s27 = int_to_ptr.hbm [resolvable:$true] %s699_s27 }
  0x48   : > { %v319_v22 = vmul.f32 0.5, %v318_v19  ;;  %v350_v28 = vmul.f32 %v504_v1, %v349_v26  ;;  %v353_v29 = vstv %s516_s28  ;;  %s701_s4 = scalar_lea.hbm %s700_s27, 4  ;;  %p706_p9 = scmp.lt.s32.totalorder %s700_s27, %s951_s5 }
  0x49   : > { %v336_v27 = vadd.f32 %v335_v21, %v333_v23  ;;  %v306_v34 = vstv %s305_s29  ;;  %p702_p1 = scmp.ne.s32.totalorder %s700_s27, %s701_s4 }
  0x4a   : > { %602 = vtanh.f32 %v319_v22  ;;  %v351_v32 = vadd.f32 %v350_v28, %v347_v25  ;;  %v289_v38 = vstv %s288_s6  ;;  %s705_s6 = scalar_lea.hbm %s951_s5, 8 }
  0x4b   : > { %v337_v31 = vmul.f32 0.5, %v336_v27  ;;  %v324_v42 = vstv %s509_s7  ;;  %p703_p4 = pnand %p702_p1, %p869_p3  ;;  %p707_p10 = scmp.lt.s32.totalorder %s705_s6, %s701_s4 }
  0x4c   : > { %v354_v35 = vadd.f32 %v353_v29, %v351_v32  ;;  %v342_v48 = vstv %s513_s9 }
  0x4d   : > { %v601_v30 = vpop.eup %600  ;;  %604 = vtanh.f32 %v337_v31  ;;  %v360_v54 = vstv %s517_s30  ;;  %p704_p8 = pneg %p703_p4  ;;  %p708_p2 = por %p707_p10, %p706_p9 }
  0x4e   : > { %v303_v33 = vmul.f32 0.5, %v601_v30  ;;  %v355_v39 = vmul.f32 0.5, %v354_v35 }
  0x4f   : > { %p709_p11 = pnand %p708_p2, %p704_p8 }
  0x50   : > { %v304_v36 = vadd.f32 0.5, %v303_v33  ;;  %v603_v37 = vpop.eup %602  ;;  %606 = vtanh.f32 %v355_v39 }
  0x51   : > { %v321_v41 = vmul.f32 0.5, %v603_v37 }
  0x52   : > { %v307_v40 = vmul.f32 %v306_v34, %v304_v36 }
  0x53   : > { %v322_v44 = vadd.f32 0.5, %v321_v41  ;;  %v605_v45 = vpop.eup %604 }
  0x54   : > { %v308_v43 = vadd.f32 %v307_v40, %v289_v38  ;;  %v339_v47 = vmul.f32 0.5, %v605_v45 }
  0x55   : > { %v325_v46 = vmul.f32 %v324_v42, %v322_v44 }
  0x56   : > { %v340_v50 = vadd.f32 0.5, %v339_v47  ;;  %v607_v51 = vpop.eup %606 }
  0x57   : > { %v326_v49 = vadd.f32 %v325_v46, %v308_v43  ;;  %v357_v53 = vmul.f32 0.5, %v607_v51 }
  0x58   : > { %v343_v52 = vmul.f32 %v342_v48, %v340_v50 }
  0x59   : > { %v358_v56 = vadd.f32 0.5, %v357_v53 }
  0x5a   : > { %v344_v55 = vadd.f32 %v343_v52, %v326_v49 }
  0x5b   : > { %v361_v57 = vmul.f32 %v360_v54, %v358_v56 }
  0x5d   : > { %v362_v58 = vadd.f32 %v361_v57, %v344_v55 }
  0x5f   : > { %v363_v59 = vmul.f32 0.5, %v362_v58 }
  0x61   : > { %608 = vtanh.f32 %v363_v59 }
  0x67   : > { %v609_v61 = vpop.eup %608 }
  0x68   : > { %v365_v62 = vmul.f32 0.5, %v609_v61 }
  0x6a   : > { %v366_v63 = vadd.f32 0.5, %v365_v62 }
  0x6c   : > { %371 = vst.msk [vmem:[%s282_s13] sm:$0xf] %vm369_vm0, %v366_v63 }
  0x6d   : > { %712 = shalt.err (!%p709_p11)
}
  0x6e   : > { %537 = dma.vmem_to_hbm [thread:$0]  (%p869_p3), %s386_s14, 64, %s388_s16, %s373_s17  }
  0x6f PF: > { %s399_s24 = sand.u32 1, %s747_s20   ;;  %p957_p12 = scmp.ge.s32.totalorder %s759_s23, 2 }
  0x70   : > { %s400_s30 = scalar_lea.sflag [#allocation5], %s399_s24 }
  0x71   : > { %p554_p13 = pnand %p957_p12, %p832_p6 }
  0x73   : > { %p555_p0 = pneg %p554_p13 }
  0x75   : > { %742 = dma.done.wait (%p555_p0), %s400_s30, 64  }
  0x76   : > { %744 = vsyncadd (%p555_p0), %s400_s30, 4294967232  ;;  %p21_p5 = scmp.ge.s32.totalorder %s856_s15, 4   ;;  %s958_s20 = smov %s751_s21 }
  0x77   : > { %s959_s21 = smov %s755_s22  ;;  %s960_s22 = smov %s865_s18 }
  0x78   : > { %s961_s23 = smov %s856_s15  ;;  %23 = sbr.rel (!%p21_p5) target bundleno = 9 (0x9), region = 99 }
  0x7d   :  { %406 = vsyncpa [#allocation4], 1 }
  0x7e   :  { %408 = vsyncpa [#allocation4 + $0x1], 1 }
  0x7f   :  { %409 = vsyncpa [#allocation5], 1 }
  0x80   :  { %411 = vsyncpa [#allocation5 + $0x1], 1 }
  0x81   :  { %412 = vsyncpa [#allocation6], 1 }
  0x82   :  { %414 = vsyncpa [#allocation6 + $0x1], 1 }
  0x83   :  { %415 = vsyncpa [#allocation9], 1 }

</bundles_post_ra>
